<compile_context>
chip_gen: v6e
topology: v6e:2x2x1
jax: 0.10.0
libtpu: 0.0.40
codegen_flags: <defaults>
</compile_context>

<pallas_src>
import functools

import jax
import jax.numpy as jnp
from jax import lax
from jax.experimental import pallas as pl
from jax.experimental.pallas import tpu as pltpu

NUM_CLS = 10
BOTTLENECK = 32      # "botten_neck" (small test size; module default is 256)
NORMALIZE = False    # matches PyTorch default normalize=False
TEMP = 0.05
LANE = 128


def _round_up(x, m):
    return ((x + m - 1) // m) * m


# ----------------------------------------------------------------------------
# Fused kernel: conv (lane-dense matmul) + ReLU + flatten + fc + ReLU +
#               [L2-normalize / temp] + classifier, all in VMEM.
# ----------------------------------------------------------------------------
def fused_tasknet_kernel(pt_ref, wct_ref, bc_ref, w1_ref, b1_ref, w2_ref,
                         b2_ref, score_ref, emb_ref, a_ref, *,
                         N, HW, Cout, normalize, inv_temp):
    # pt_ref : (K, N*HW)         im2col patches, transposed (lane-dense)
    # wct_ref: (Cout, K)         conv weight, PyTorch OIHW flattened
    # bc_ref : (Cout, 1)
    # w1_ref : (Cout*HW, Dpad)   fc weight (in, out), zero-padded to 128 lanes
    # b1_ref : (1, Dpad)
    # w2_ref : (Dpad, Cpad), b2_ref: (1, Cpad)
    # score_ref: (N, Cpad), emb_ref: (N, Dpad)
    # a_ref  : (N, Cout*HW) f32 VMEM scratch (flattened conv activation)
    mxu_dtype = pt_ref.dtype

    # conv_params: 3x3 "SAME" conv as ONE MXU matmul; bias + ReLU on the VPU.
    conv_t = jnp.dot(wct_ref[...], pt_ref[...],
                     preferred_element_type=jnp.float32)       # (Cout, N*HW)
    conv_t = jnp.maximum(conv_t + bc_ref[...], 0.0)

    # x.view(N, -1): regroup (Cout, N*HW) -> (N, Cout*HW) feature order (co,hw).
    # Done once via lane-aligned HW-wide slab copies into VMEM scratch (HW is a
    # multiple of 128), instead of N*Cout M=1 matmul pushes.
    for n in range(N):
        for co in range(Cout):
            a_ref[n:n + 1, co * HW:(co + 1) * HW] = \
                conv_t[co:co + 1, n * HW:(n + 1) * HW]

    # fc_params: ONE batched matmul (N, Cout*HW) @ (Cout*HW, Dpad), f32 acc.
    a = a_ref[...].astype(mxu_dtype)
    emb = jnp.dot(a, w1_ref[...],
                  preferred_element_type=jnp.float32) + b1_ref[...]
    emb = jnp.maximum(emb, 0.0)                                # (N, Dpad)

    # TODO(synk): GradientReverseFunction is identity in forward; its backward
    #             gradient sign-flip is not representable in a forward kernel.
    if normalize:
        # F.normalize(emb) / temp  ==  emb * rsqrt(max(||emb||^2, 1e-24)) / temp
        ssq = jnp.sum(emb * emb, axis=-1, keepdims=True)
        emb = emb * (lax.rsqrt(jnp.maximum(ssq, 1e-24)) * inv_temp)

    # classifier: ONE matmul (N, Dpad) @ (Dpad, Cpad).
    score = jnp.dot(emb.astype(mxu_dtype), w2_ref[...],
                    preferred_element_type=jnp.float32) + b2_ref[...]

    # Single full-block, lane-dense (x128) stores.
    emb_ref[...] = emb
    score_ref[...] = score


# ----------------------------------------------------------------------------
# TaskNet.forward (wrapper: layout plumbing only, single pallas_call)
# ----------------------------------------------------------------------------
def tasknet_forward(x_nchw, params, with_emb=False, normalize=NORMALIZE,
                    temp=TEMP, mxu_dtype=jnp.float32):
    N, Cin, H, W = x_nchw.shape
    conv_w = params["conv_w"]            # (Cout, Cin, 3, 3)  PyTorch OIHW
    Cout = conv_w.shape[0]
    D = params["fc_w"].shape[0]          # fc_w : (D, Cout*H*W)  (out, in)
    C = params["cls_w"].shape[0]         # cls_w: (C, D)
    HW = H * W
    K = Cin * 9
    Dp = _round_up(D, LANE)              # pad bottleneck to 128 lanes
    Cp = _round_up(C, LANE)              # pad num_cls to 128 lanes

    # im2col, transposed so N*HW sits on lanes (lane-dense MXU feed).
    xp = jnp.pad(x_nchw, ((0, 0), (0, 0), (1, 1), (1, 1)))
    cols = [xp[:, :, kh:kh + H, kw:kw + W]
            for kh in range(3) for kw in range(3)]          # each (N,Cin,H,W)
    pt = jnp.stack(cols, axis=2).reshape(N, K, HW)          # k = (ci, kh, kw)
    pt = pt.transpose(1, 0, 2).reshape(K, N * HW).astype(mxu_dtype)  # (K, N*HW)

    # Weight layout prep (one-time in a real model; plain-JAX glue here).
    wct = conv_w.reshape(Cout, K).astype(mxu_dtype)               # (Cout, K)
    bc = params["conv_b"].reshape(Cout, 1).astype(jnp.float32)
    w1 = jnp.zeros((Cout * HW, Dp), mxu_dtype).at[:, :D].set(
        params["fc_w"].T.astype(mxu_dtype))                        # (F, Dpad)
    b1 = jnp.zeros((1, Dp), jnp.float32).at[:, :D].set(params["fc_b"])
    w2 = jnp.zeros((Dp, Cp), mxu_dtype).at[:D, :C].set(
        params["cls_w"].T.astype(mxu_dtype))                       # (Dpad,Cpad)
    b2 = jnp.zeros((1, Cp), jnp.float32).at[:, :C].set(params["cls_b"])

    kern = functools.partial(fused_tasknet_kernel, N=N, HW=HW, Cout=Cout,
                             normalize=normalize, inv_temp=1.0 / temp)

    flops = (2 * Cout * K * N * HW + 2 * N * (Cout * HW) * Dp + 2 * N * Dp * Cp)
    bytes_accessed = int(
        pt.size * pt.dtype.itemsize + wct.size * wct.dtype.itemsize
        + bc.size * 4 + w1.size * w1.dtype.itemsize + b1.size * 4
        + w2.size * w2.dtype.itemsize + b2.size * 4 + N * Cp * 4 + N * Dp * 4)

    vmem = pl.BlockSpec(memory_space=pltpu.MemorySpace.VMEM)
    score_p, emb_p = pl.pallas_call(
        kern,
        out_shape=(jax.ShapeDtypeStruct((N, Cp), jnp.float32),   # score (padded)
                   jax.ShapeDtypeStruct((N, Dp), jnp.float32)),  # emb   (padded)
        in_specs=[vmem] * 7,
        out_specs=(vmem, vmem),
        scratch_shapes=[pltpu.VMEM((N, Cout * HW), jnp.float32)],
        cost_estimate=pl.CostEstimate(flops=flops,
                                      transcendentals=N if normalize else 0,
                                      bytes_accessed=bytes_accessed),
    )(pt, wct, bc, w1, b1, w2, b2)

    score = score_p[:, :C]
    emb = emb_p[:, :D]
    return (score, emb) if with_emb else score


if __name__ == "__main__":
    key = jax.random.PRNGKey(0)
    N, Cin, H, W = 2, 3, 16, 16     # num_channels = 3 (module attr), small spatial
    Cout = 8
    ks = jax.random.split(key, 6)

    x = jax.random.normal(ks[0], (N, Cin, H, W), jnp.float32)
    params = {
        "conv_w": jax.random.normal(ks[1], (Cout, Cin, 3, 3), jnp.float32) * 0.1,
        "conv_b": jax.random.normal(ks[2], (Cout,), jnp.float32) * 0.1,
        "fc_w":   jax.random.normal(ks[3], (BOTTLENECK, Cout * H * W),
                                    jnp.float32) * 0.02,
        "fc_b":   jnp.zeros((BOTTLENECK,), jnp.float32),
        "cls_w":  jax.random.normal(ks[4], (NUM_CLS, BOTTLENECK),
                                    jnp.float32) * 0.05,
        "cls_b":  jnp.zeros((NUM_CLS,), jnp.float32),
    }

    fwd = jax.jit(tasknet_forward,
                  static_argnames=("with_emb", "normalize", "temp", "mxu_dtype"))

    score, emb = fwd(x, params, with_emb=True)
    score, emb = jax.block_until_ready((score, emb))

    # Pure-JAX reference with PyTorch (NCHW / OIHW / Linear (out,in)) semantics.
    href = jax.lax.conv_general_dilated(
        x, params["conv_w"], (1, 1), "SAME",
        dimension_numbers=("NCHW", "OIHW", "NCHW"))
    href = jnp.maximum(href + params["conv_b"][None, :, None, None], 0.0)
    flat = href.reshape(N, -1)                                 # x.view(N, -1)
    eref = jnp.maximum(flat @ params["fc_w"].T + params["fc_b"], 0.0)
    sref = eref @ params["cls_w"].T + params["cls_b"]

    assert score.shape == (N, NUM_CLS) and emb.shape == (N, BOTTLENECK)
    assert jnp.allclose(emb, eref, atol=1e-3, rtol=1e-3)
    assert jnp.allclose(score, sref, atol=1e-3, rtol=1e-3)

    # normalize=True path: emb = F.normalize(emb) / temp, then classifier.
    score_n, emb_n = fwd(x, params, with_emb=True, normalize=True)
    score_n, emb_n = jax.block_until_ready((score_n, emb_n))
    eref_n = eref / jnp.maximum(
        jnp.linalg.norm(eref, axis=-1, keepdims=True), 1e-12) / TEMP
    sref_n = eref_n @ params["cls_w"].T + params["cls_b"]
    assert jnp.allclose(emb_n, eref_n, atol=1e-3, rtol=1e-3)
    assert jnp.allclose(score_n, sref_n, atol=1e-3, rtol=1e-3)

    # bf16 MXU operands (the v6e/v7x fast path); f32 accumulation, loose check.
    score_b, emb_b = fwd(x, params, with_emb=True, mxu_dtype=jnp.bfloat16)
    score_b, emb_b = jax.block_until_ready((score_b, emb_b))
    assert jnp.allclose(emb_b, eref, atol=1e-1, rtol=1e-1)
    assert jnp.allclose(score_b, sref, atol=1e-1, rtol=1e-1)

    print("KERNEL_OK")
</pallas_src>

<mosaic_0001>
module attributes {stable_mosaic.version = 11 : i64} {
  func.func @fused_tasknet_kernel(%arg0: memref<27x512xf32, #tpu.memory_space<vmem>>, %arg1: memref<8x27xf32, #tpu.memory_space<vmem>>, %arg2: memref<8x1xf32, #tpu.memory_space<vmem>>, %arg3: memref<2048x128xf32, #tpu.memory_space<vmem>>, %arg4: memref<1x128xf32, #tpu.memory_space<vmem>>, %arg5: memref<128x128xf32, #tpu.memory_space<vmem>>, %arg6: memref<1x128xf32, #tpu.memory_space<vmem>>, %arg7: memref<2x128xf32, #tpu.memory_space<vmem>>, %arg8: memref<2x128xf32, #tpu.memory_space<vmem>>, %arg9: memref<2x2048xf32, #tpu.memory_space<vmem>>) attributes {dimension_semantics = [], scalar_prefetch = 0 : i64, scratch_operands = 1 : i64, tpu.core_type = #tpu.core_type<tc>} {
    %c0 = arith.constant 0 : index
    %c0_0 = arith.constant 0 : index
    %0 = vector.load %arg1[%c0, %c0_0] : memref<8x27xf32, #tpu.memory_space<vmem>>, vector<8x27xf32>
    %c0_1 = arith.constant 0 : index
    %c0_2 = arith.constant 0 : index
    %1 = vector.load %arg0[%c0_1, %c0_2] : memref<27x512xf32, #tpu.memory_space<vmem>>, vector<27x512xf32>
    %cst = arith.constant dense<0.000000e+00> : vector<8x512xf32>
    %2 = tpu.matmul %0, %1, %cst {dimension_numbers = #tpu.dot_dimension_numbers<[1], [0], [0], [1], [0, 0, 1, 1], [], []>} : vector<8x27xf32>, vector<27x512xf32>, vector<8x512xf32> -> vector<8x512xf32>
    %c0_3 = arith.constant 0 : index
    %c0_4 = arith.constant 0 : index
    %3 = vector.load %arg2[%c0_3, %c0_4] : memref<8x1xf32, #tpu.memory_space<vmem>>, vector<8x1xf32>
    %4 = vector.broadcast %3 : vector<8x1xf32> to vector<8x512xf32>
    %5 = arith.addf %2, %4 : vector<8x512xf32>
    %cst_5 = arith.constant 0.000000e+00 : f32
    %6 = vector.broadcast %cst_5 : f32 to vector<8x512xf32>
    %7 = arith.maximumf %5, %6 : vector<8x512xf32>
    %8 = vector.extract_strided_slice %7 {offsets = [0, 0], sizes = [1, 256], strides = [1, 1]} : vector<8x512xf32> to vector<1x256xf32>
    %c0_6 = arith.constant 0 : index
    %c0_7 = arith.constant 0 : index
    %9 = vector.load %arg9[%c0_6, %c0_7] : memref<2x2048xf32, #tpu.memory_space<vmem>>, vector<1x256xf32>
    tpu.vector_store %arg9[%c0_6, %c0_7], %8 {strides = array<i32>} : memref<2x2048xf32, #tpu.memory_space<vmem>>, vector<1x256xf32>,
    %10 = vector.extract_strided_slice %7 {offsets = [1, 0], sizes = [1, 256], strides = [1, 1]} : vector<8x512xf32> to vector<1x256xf32>
    %c0_8 = arith.constant 0 : index
    %c256 = arith.constant 256 : index
    %11 = vector.load %arg9[%c0_8, %c256] : memref<2x2048xf32, #tpu.memory_space<vmem>>, vector<1x256xf32>
    tpu.vector_store %arg9[%c0_8, %c256], %10 {strides = array<i32>} : memref<2x2048xf32, #tpu.memory_space<vmem>>, vector<1x256xf32>,
    %12 = vector.extract_strided_slice %7 {offsets = [2, 0], sizes = [1, 256], strides = [1, 1]} : vector<8x512xf32> to vector<1x256xf32>
    %c0_9 = arith.constant 0 : index
    %c512 = arith.constant 512 : index
    %13 = vector.load %arg9[%c0_9, %c512] : memref<2x2048xf32, #tpu.memory_space<vmem>>, vector<1x256xf32>
    tpu.vector_store %arg9[%c0_9, %c512], %12 {strides = array<i32>} : memref<2x2048xf32, #tpu.memory_space<vmem>>, vector<1x256xf32>,
    %14 = vector.extract_strided_slice %7 {offsets = [3, 0], sizes = [1, 256], strides = [1, 1]} : vector<8x512xf32> to vector<1x256xf32>
    %c0_10 = arith.constant 0 : index
    %c768 = arith.constant 768 : index
    %15 = vector.load %arg9[%c0_10, %c768] : memref<2x2048xf32, #tpu.memory_space<vmem>>, vector<1x256xf32>
    tpu.vector_store %arg9[%c0_10, %c768], %14 {strides = array<i32>} : memref<2x2048xf32, #tpu.memory_space<vmem>>, vector<1x256xf32>,
    %16 = vector.extract_strided_slice %7 {offsets = [4, 0], sizes = [1, 256], strides = [1, 1]} : vector<8x512xf32> to vector<1x256xf32>
    %c0_11 = arith.constant 0 : index
    %c1024 = arith.constant 1024 : index
    %17 = vector.load %arg9[%c0_11, %c1024] : memref<2x2048xf32, #tpu.memory_space<vmem>>, vector<1x256xf32>
    tpu.vector_store %arg9[%c0_11, %c1024], %16 {strides = array<i32>} : memref<2x2048xf32, #tpu.memory_space<vmem>>, vector<1x256xf32>,
    %18 = vector.extract_strided_slice %7 {offsets = [5, 0], sizes = [1, 256], strides = [1, 1]} : vector<8x512xf32> to vector<1x256xf32>
    %c0_12 = arith.constant 0 : index
    %c1280 = arith.constant 1280 : index
    %19 = vector.load %arg9[%c0_12, %c1280] : memref<2x2048xf32, #tpu.memory_space<vmem>>, vector<1x256xf32>
    tpu.vector_store %arg9[%c0_12, %c1280], %18 {strides = array<i32>} : memref<2x2048xf32, #tpu.memory_space<vmem>>, vector<1x256xf32>,
    %20 = vector.extract_strided_slice %7 {offsets = [6, 0], sizes = [1, 256], strides = [1, 1]} : vector<8x512xf32> to vector<1x256xf32>
    %c0_13 = arith.constant 0 : index
    %c1536 = arith.constant 1536 : index
    %21 = vector.load %arg9[%c0_13, %c1536] : memref<2x2048xf32, #tpu.memory_space<vmem>>, vector<1x256xf32>
    tpu.vector_store %arg9[%c0_13, %c1536], %20 {strides = array<i32>} : memref<2x2048xf32, #tpu.memory_space<vmem>>, vector<1x256xf32>,
    %22 = vector.extract_strided_slice %7 {offsets = [7, 0], sizes = [1, 256], strides = [1, 1]} : vector<8x512xf32> to vector<1x256xf32>
    %c0_14 = arith.constant 0 : index
    %c1792 = arith.constant 1792 : index
    %23 = vector.load %arg9[%c0_14, %c1792] : memref<2x2048xf32, #tpu.memory_space<vmem>>, vector<1x256xf32>
    tpu.vector_store %arg9[%c0_14, %c1792], %22 {strides = array<i32>} : memref<2x2048xf32, #tpu.memory_space<vmem>>, vector<1x256xf32>,
    %24 = vector.extract_strided_slice %7 {offsets = [0, 256], sizes = [1, 256], strides = [1, 1]} : vector<8x512xf32> to vector<1x256xf32>
    %c1 = arith.constant 1 : index
    %c0_15 = arith.constant 0 : index
    %25 = vector.load %arg9[%c1, %c0_15] : memref<2x2048xf32, #tpu.memory_space<vmem>>, vector<1x256xf32>
    tpu.vector_store %arg9[%c1, %c0_15], %24 {strides = array<i32>} : memref<2x2048xf32, #tpu.memory_space<vmem>>, vector<1x256xf32>,
    %26 = vector.extract_strided_slice %7 {offsets = [1, 256], sizes = [1, 256], strides = [1, 1]} : vector<8x512xf32> to vector<1x256xf32>
    %c1_16 = arith.constant 1 : index
    %c256_17 = arith.constant 256 : index
    %27 = vector.load %arg9[%c1_16, %c256_17] : memref<2x2048xf32, #tpu.memory_space<vmem>>, vector<1x256xf32>
    tpu.vector_store %arg9[%c1_16, %c256_17], %26 {strides = array<i32>} : memref<2x2048xf32, #tpu.memory_space<vmem>>, vector<1x256xf32>,
    %28 = vector.extract_strided_slice %7 {offsets = [2, 256], sizes = [1, 256], strides = [1, 1]} : vector<8x512xf32> to vector<1x256xf32>
    %c1_18 = arith.constant 1 : index
    %c512_19 = arith.constant 512 : index
    %29 = vector.load %arg9[%c1_18, %c512_19] : memref<2x2048xf32, #tpu.memory_space<vmem>>, vector<1x256xf32>
    tpu.vector_store %arg9[%c1_18, %c512_19], %28 {strides = array<i32>} : memref<2x2048xf32, #tpu.memory_space<vmem>>, vector<1x256xf32>,
    %30 = vector.extract_strided_slice %7 {offsets = [3, 256], sizes = [1, 256], strides = [1, 1]} : vector<8x512xf32> to vector<1x256xf32>
    %c1_20 = arith.constant 1 : index
    %c768_21 = arith.constant 768 : index
    %31 = vector.load %arg9[%c1_20, %c768_21] : memref<2x2048xf32, #tpu.memory_space<vmem>>, vector<1x256xf32>
    tpu.vector_store %arg9[%c1_20, %c768_21], %30 {strides = array<i32>} : memref<2x2048xf32, #tpu.memory_space<vmem>>, vector<1x256xf32>,
    %32 = vector.extract_strided_slice %7 {offsets = [4, 256], sizes = [1, 256], strides = [1, 1]} : vector<8x512xf32> to vector<1x256xf32>
    %c1_22 = arith.constant 1 : index
    %c1024_23 = arith.constant 1024 : index
    %33 = vector.load %arg9[%c1_22, %c1024_23] : memref<2x2048xf32, #tpu.memory_space<vmem>>, vector<1x256xf32>
    tpu.vector_store %arg9[%c1_22, %c1024_23], %32 {strides = array<i32>} : memref<2x2048xf32, #tpu.memory_space<vmem>>, vector<1x256xf32>,
    %34 = vector.extract_strided_slice %7 {offsets = [5, 256], sizes = [1, 256], strides = [1, 1]} : vector<8x512xf32> to vector<1x256xf32>
    %c1_24 = arith.constant 1 : index
    %c1280_25 = arith.constant 1280 : index
    %35 = vector.load %arg9[%c1_24, %c1280_25] : memref<2x2048xf32, #tpu.memory_space<vmem>>, vector<1x256xf32>
    tpu.vector_store %arg9[%c1_24, %c1280_25], %34 {strides = array<i32>} : memref<2x2048xf32, #tpu.memory_space<vmem>>, vector<1x256xf32>,
    %36 = vector.extract_strided_slice %7 {offsets = [6, 256], sizes = [1, 256], strides = [1, 1]} : vector<8x512xf32> to vector<1x256xf32>
    %c1_26 = arith.constant 1 : index
    %c1536_27 = arith.constant 1536 : index
    %37 = vector.load %arg9[%c1_26, %c1536_27] : memref<2x2048xf32, #tpu.memory_space<vmem>>, vector<1x256xf32>
    tpu.vector_store %arg9[%c1_26, %c1536_27], %36 {strides = array<i32>} : memref<2x2048xf32, #tpu.memory_space<vmem>>, vector<1x256xf32>,
    %38 = vector.extract_strided_slice %7 {offsets = [7, 256], sizes = [1, 256], strides = [1, 1]} : vector<8x512xf32> to vector<1x256xf32>
    %c1_28 = arith.constant 1 : index
    %c1792_29 = arith.constant 1792 : index
    %39 = vector.load %arg9[%c1_28, %c1792_29] : memref<2x2048xf32, #tpu.memory_space<vmem>>, vector<1x256xf32>
    tpu.vector_store %arg9[%c1_28, %c1792_29], %38 {strides = array<i32>} : memref<2x2048xf32, #tpu.memory_space<vmem>>, vector<1x256xf32>,
    %c0_30 = arith.constant 0 : index
    %c0_31 = arith.constant 0 : index
    %40 = vector.load %arg9[%c0_30, %c0_31] : memref<2x2048xf32, #tpu.memory_space<vmem>>, vector<2x2048xf32>
    %c0_32 = arith.constant 0 : index
    %c0_33 = arith.constant 0 : index
    %41 = vector.load %arg3[%c0_32, %c0_33] : memref<2048x128xf32, #tpu.memory_space<vmem>>, vector<2048x128xf32>
    %cst_34 = arith.constant dense<0.000000e+00> : vector<2x128xf32>
    %42 = tpu.matmul %40, %41, %cst_34 {dimension_numbers = #tpu.dot_dimension_numbers<[1], [0], [0], [1], [0, 0, 1, 1], [], []>} : vector<2x2048xf32>, vector<2048x128xf32>, vector<2x128xf32> -> vector<2x128xf32>
    %c0_35 = arith.constant 0 : index
    %c0_36 = arith.constant 0 : index
    %43 = vector.load %arg4[%c0_35, %c0_36] : memref<1x128xf32, #tpu.memory_space<vmem>>, vector<1x128xf32>
    %44 = vector.broadcast %43 : vector<1x128xf32> to vector<2x128xf32>
    %45 = arith.addf %42, %44 : vector<2x128xf32>
    %cst_37 = arith.constant 0.000000e+00 : f32
    %46 = vector.broadcast %cst_37 : f32 to vector<2x128xf32>
    %47 = arith.maximumf %45, %46 : vector<2x128xf32>
    %c0_38 = arith.constant 0 : index
    %c0_39 = arith.constant 0 : index
    %48 = vector.load %arg5[%c0_38, %c0_39] : memref<128x128xf32, #tpu.memory_space<vmem>>, vector<128x128xf32>
    %cst_40 = arith.constant dense<0.000000e+00> : vector<2x128xf32>
    %49 = tpu.matmul %47, %48, %cst_40 {dimension_numbers = #tpu.dot_dimension_numbers<[1], [0], [0], [1], [0, 0, 1, 1], [], []>} : vector<2x128xf32>, vector<128x128xf32>, vector<2x128xf32> -> vector<2x128xf32>
    %c0_41 = arith.constant 0 : index
    %c0_42 = arith.constant 0 : index
    %50 = vector.load %arg6[%c0_41, %c0_42] : memref<1x128xf32, #tpu.memory_space<vmem>>, vector<1x128xf32>
    %51 = vector.broadcast %50 : vector<1x128xf32> to vector<2x128xf32>
    %52 = arith.addf %49, %51 : vector<2x128xf32>
    %c0_43 = arith.constant 0 : index
    %c0_44 = arith.constant 0 : index
    %53 = vector.load %arg8[%c0_43, %c0_44] : memref<2x128xf32, #tpu.memory_space<vmem>>, vector<2x128xf32>
    tpu.vector_store %arg8[%c0_43, %c0_44], %47 {strides = array<i32>} : memref<2x128xf32, #tpu.memory_space<vmem>>, vector<2x128xf32>,
    %c0_45 = arith.constant 0 : index
    %c0_46 = arith.constant 0 : index
    %54 = vector.load %arg7[%c0_45, %c0_46] : memref<2x128xf32, #tpu.memory_space<vmem>>, vector<2x128xf32>
    tpu.vector_store %arg7[%c0_45, %c0_46], %52 {strides = array<i32>} : memref<2x128xf32, #tpu.memory_space<vmem>>, vector<2x128xf32>,
    return
  }
}

</mosaic_0001>

<bundles_post_ra>
// kernel: tasknet_forward.1
= control target key start
LH: loop header
LB: loop body
LE: loop exit
PB: predicated region body
PF: predicated region fallthrough
CT: control target
= control target key end

     0   :  { %14 = vsyncpa [#allocation4], 0  ;;  %vm57_vm0 = vcmask 1042432   ;;  %v1806_v5 = vmov 0.0   ;;  %v1807_v7 = vmov 0   ;;  %vm53_vm1 = vcmask 220160   ;;  %s2841_s0 = inlined_call_operand.vmem [shape: f32[27,512], index: 0, kind: input, shape index: {}]   ;;  %s2842_s1 = inlined_call_operand.vmem [shape: f32[8,27], index: 1, kind: input, shape index: {}]   ;;  %s2843_s2 = inlined_call_operand.vmem [shape: f32[8,1], index: 2, kind: input, shape index: {}]   ;;  %s2844_s3 = inlined_call_operand.vmem [shape: f32[2048,128], index: 3, kind: input, shape index: {}]   ;;  %s2845_s4 = inlined_call_operand.vmem [shape: f32[1,128], index: 4, kind: input, shape index: {}]   ;;  %s2846_s5 = inlined_call_operand.vmem [shape: f32[128,128], index: 5, kind: input, shape index: {}]   ;;  %s2847_s6 = inlined_call_operand.vmem [shape: f32[1,128], index: 6, kind: input, shape index: {}]   ;;  %s2848_s7 = inlined_call_operand.hbm [shape: f32[2,128], index: 7, kind: output, shape index: {0}]   ;;  %s2849_s8 = inlined_call_operand.hbm [shape: f32[2,128], index: 8, kind: output, shape index: {1}]  }
   0x1   :  { %v44_v0 = vld [vmem:[%s2841_s0 + $0x68] sm:$0x7]  ;;  %v43_v1 = vld [vmem:[%s2841_s0 + $0x60] sm:$0x7]  ;;  %134 = vmatprep.mubr.f32.mxu1 %v1806_v5  ;;  %1757 = vset.pattern.permute.xlu0 %v1807_v7  ;;  %v46_v12 = vld [vmem:[%s2841_s0 + $0x78] sm:$0x7] }
   0x2   :  { %v40_v2 = vld [vmem:[%s2841_s0 + $0x48] sm:$0xff]  ;;  %1410 = vmatprep.subr.msk.mxu1 %vm57_vm0, %v44_v0  ;;  %v39_v3 = vld [vmem:[%s2841_s0 + $0x40] sm:$0xff] }
   0x3   :  { %1411 = vmatpush1.msk.msra.mxu1 %vm57_vm0, %v43_v1  ;;  %v36_v4 = vld [vmem:[%s2841_s0 + $0x28] sm:$0xff]  ;;  %v35_v6 = vld [vmem:[%s2841_s0 + $0x20] sm:$0xff] }
   0x4   :  { %96 = vmatprep.subr.mxu1 %v40_v2  ;;  %v32_v8 = vld [vmem:[%s2841_s0 + $0x8] sm:$0xff]  ;;  %v31_v9 = vld [vmem:[%s2841_s0] sm:$0xff] }
   0x5   :  { %97 = vmatpush1.msra.mxu1 %v39_v3  ;;  %v47_v10 = vld [vmem:[%s2843_s2] sm:$0xff] }
   0x6   :  { %98 = vmatprep.subr.mxu1 %v36_v4  ;;  %v30_v11 = vld [vmem:[%s2842_s1] sm:$0xff]  ;;  %50 = vperm.xlu0 %1757, %v47_v10  }
   0x7   :  { %99 = vmatpush1.msra.mxu1 %v35_v6 }
   0x8   :  { %15 = vsyncpa [#allocation6], 0  ;;  %100 = vmatprep.subr.mxu1 %v32_v8  ;;  %v45_v13 = vld [vmem:[%s2841_s0 + $0x70] sm:$0x7]  ;;  %v42_v14 = vld [vmem:[%s2841_s0 + $0x58] sm:$0xff]  ;;  %vm1810_vm3 = vmmov 0  }
   0x9   :  { %101 = vmatpush1.msra.mxu1 %v31_v9  ;;  %v41_v15 = vld [vmem:[%s2841_s0 + $0x50] sm:$0xff]  ;;  %v38_v16 = vld [vmem:[%s2841_s0 + $0x38] sm:$0xff]  ;;  %v404_v26 = vld [vmem:[%s2844_s3 + $0xe8] sm:$0xff] }
   0xa   :  { %1412 = vmatmul.mubr.msk.f32.vlgmr.msra.gmra.mxu1 %vm53_vm1, %v30_v11  ;;  %1413 = vmatprep.subr.msk.mxu1 %vm57_vm0, %v46_v12  ;;  %v37_v17 = vld [vmem:[%s2841_s0 + $0x30] sm:$0xff]  ;;  %v34_v18 = vld [vmem:[%s2841_s0 + $0x18] sm:$0xff]  ;;  %v388_v28 = vld [vmem:[%s2844_s3 + $0x68] sm:$0xff] }
   0xb   :  { %1414 = vmatpush1.msk.msra.mxu1 %vm57_vm0, %v45_v13  ;;  %205 = vmatprep.mubr.f32.mxu1 %v1806_v5  ;;  %v33_v19 = vld [vmem:[%s2841_s0 + $0x10] sm:$0xff]  ;;  %v406_v20 = vld [vmem:[%s2844_s3 + $0xf8] sm:$0xff]  ;;  %v403_v30 = vld [vmem:[%s2844_s3 + $0xe0] sm:$0xff] }
   0xc   :  { %167 = vmatprep.subr.mxu1 %v42_v14  ;;  %1418 = vmatprep.subr.mxu0 %v406_v20  ;;  %v390_v21 = vld [vmem:[%s2844_s3 + $0x78] sm:$0xff]  ;;  %v405_v22 = vld [vmem:[%s2844_s3 + $0xf0] sm:$0xff]  ;;  %v436_v31 = vld [vmem:[%s2844_s3 + $0x1e8] sm:$0xff] }
   0xd   :  { %168 = vmatpush1.msra.mxu1 %v41_v15  ;;  %1419 = vmatpush3.msra.mxu0 %v390_v21  ;;  %v438_v23 = vld [vmem:[%s2844_s3 + $0x1f8] sm:$0xff]  ;;  %v389_v24 = vld [vmem:[%s2844_s3 + $0x70] sm:$0xff]  ;;  %v387_v32 = vld [vmem:[%s2844_s3 + $0x60] sm:$0xff] }
   0xe   :  { %169 = vmatprep.subr.mxu1 %v38_v16  ;;  %1420 = vmatprep.subr.mxu0 %v405_v22  ;;  %v422_v25 = vld [vmem:[%s2844_s3 + $0x178] sm:$0xff]  ;;  %v437_v27 = vld [vmem:[%s2844_s3 + $0x1f0] sm:$0xff]  ;;  %v420_v33 = vld [vmem:[%s2844_s3 + $0x168] sm:$0xff] }
   0xf   :  { %170 = vmatpush1.msra.mxu1 %v37_v17  ;;  %1421 = vmatpush3.msra.mxu0 %v389_v24  ;;  %v421_v29 = vld [vmem:[%s2844_s3 + $0x170] sm:$0xff]  ;;  %v402_v34 = vld [vmem:[%s2844_s3 + $0xd8] sm:$0xff]  ;;  %v435_v35 = vld [vmem:[%s2844_s3 + $0x1e0] sm:$0xff] }
  0x10   :  { %171 = vmatprep.subr.mxu1 %v34_v18  ;;  %1422 = vmatprep.subr.mxu0 %v404_v26  ;;  %v386_v36 = vld [vmem:[%s2844_s3 + $0x58] sm:$0xff]  ;;  %v419_v37 = vld [vmem:[%s2844_s3 + $0x160] sm:$0xff]  ;;  %v401_v38 = vld [vmem:[%s2844_s3 + $0xd0] sm:$0xff] }
  0x11   :  { %172 = vmatpush1.msra.mxu1 %v33_v19  ;;  %1423 = vmatpush3.msra.mxu0 %v388_v28  ;;  %v434_v39 = vld [vmem:[%s2844_s3 + $0x1d8] sm:$0xff]  ;;  %v385_v40 = vld [vmem:[%s2844_s3 + $0x50] sm:$0xff]  ;;  %v400_v42 = vld [vmem:[%s2844_s3 + $0xc8] sm:$0xff] }
  0x12   :  { %1415 = vmatmul.mubr.msk.f32.vlgmr.msra.gmra.mxu1 %vm53_vm1, %v30_v11  ;;  %1453 = vmatprep.subr.mxu1 %v438_v23  ;;  %v418_v41 = vld [vmem:[%s2844_s3 + $0x158] sm:$0xff]  ;;  %v433_v43 = vld [vmem:[%s2844_s3 + $0x1d0] sm:$0xff]  ;;  %v384_v44 = vld [vmem:[%s2844_s3 + $0x48] sm:$0xff]  ;;  %v1808_v23 = vmov 1966171168  }
  0x13   :  { %1454 = vmatpush3.msra.mxu1 %v422_v25  ;;  %1424 = vmatprep.subr.mxu0 %v403_v30  ;;  %v417_v45 = vld [vmem:[%s2844_s3 + $0x150] sm:$0xff]  ;;  %v399_v46 = vld [vmem:[%s2844_s3 + $0xc0] sm:$0xff]  ;;  %v432_v47 = vld [vmem:[%s2844_s3 + $0x1c8] sm:$0xff]  ;;  %v220_v24 = vunpack.c.l.s4 %v1808_v23  ;;  %v222_v25 = vlaneseq }
  0x14   :  { %1455 = vmatprep.subr.mxu1 %v437_v27  ;;  %1425 = vmatpush3.msra.mxu0 %v387_v32  ;;  %v383_v48 = vld [vmem:[%s2844_s3 + $0x40] sm:$0xff]  ;;  %v416_v49 = vld [vmem:[%s2844_s3 + $0x148] sm:$0xff]  ;;  %v398_v50 = vld [vmem:[%s2844_s3 + $0xb8] sm:$0xff] }
  0x15   :  { %1456 = vmatpush3.msra.mxu1 %v421_v29  ;;  %1426 = vmatprep.subr.mxu0 %v402_v34  ;;  %v431_v51 = vld [vmem:[%s2844_s3 + $0x1c0] sm:$0xff]  ;;  %v382_v52 = vld [vmem:[%s2844_s3 + $0x38] sm:$0xff]  ;;  %v397_v54 = vld [vmem:[%s2844_s3 + $0xb0] sm:$0xff]  ;;  %v221_v29 = vunpack.c.0.s8 %v220_v24  ;;  %v223_v30 = vshrl.u32 %v222_v25, 7  ;;  %vm2118_vm2 = vcmp.lt.s32.totalorder %v222_v25, 256 }
  0x16   :  { %1457 = vmatprep.subr.mxu1 %v436_v31  ;;  %1427 = vmatpush3.msra.mxu0 %v386_v36  ;;  %v415_v53 = vld [vmem:[%s2844_s3 + $0x140] sm:$0xff]  ;;  %v430_v55 = vld [vmem:[%s2844_s3 + $0x1b8] sm:$0xff]  ;;  %v381_v56 = vld [vmem:[%s2844_s3 + $0x30] sm:$0xff] }
  0x17   :  { %1458 = vmatpush3.msra.mxu1 %v420_v33  ;;  %1428 = vmatprep.subr.mxu0 %v401_v38  ;;  %v414_v57 = vld [vmem:[%s2844_s3 + $0x138] sm:$0xff]  ;;  %v396_v58 = vld [vmem:[%s2844_s3 + $0xa8] sm:$0xff]  ;;  %v429_v59 = vld [vmem:[%s2844_s3 + $0x1b0] sm:$0xff] }
  0x18   :  { %1459 = vmatprep.subr.mxu1 %v435_v35  ;;  %1429 = vmatpush3.msra.mxu0 %v385_v40  ;;  %v380_v60 = vld [vmem:[%s2844_s3 + $0x28] sm:$0xff]  ;;  %v413_v61 = vld [vmem:[%s2844_s3 + $0x130] sm:$0xff]  ;;  %v395_v62 = vld [vmem:[%s2844_s3 + $0xa0] sm:$0xff]  ;;  %v224_v35 = vsub.s32 %v221_v29, %v223_v30 }
  0x19   :  { %1460 = vmatpush3.msra.mxu1 %v419_v37  ;;  %1430 = vmatprep.subr.mxu0 %v400_v42  ;;  %v428_v63 = vld [vmem:[%s2844_s3 + $0x1a8] sm:$0xff]  ;;  %v379_v0 = vld [vmem:[%s2844_s3 + $0x20] sm:$0xff]  ;;  %v394_v2 = vld [vmem:[%s2844_s3 + $0x98] sm:$0xff] }
  0x1a   :  { %1461 = vmatprep.subr.mxu1 %v434_v39  ;;  %1431 = vmatpush3.msra.mxu0 %v384_v44  ;;  %v412_v1 = vld [vmem:[%s2844_s3 + $0x128] sm:$0xff]  ;;  %v427_v3 = vld [vmem:[%s2844_s3 + $0x1a0] sm:$0xff]  ;;  %v378_v4 = vld [vmem:[%s2844_s3 + $0x18] sm:$0xff] }
  0x1b   :  { %1462 = vmatpush3.msra.mxu1 %v418_v41  ;;  %1432 = vmatprep.subr.mxu0 %v399_v46  ;;  %v411_v6 = vld [vmem:[%s2844_s3 + $0x120] sm:$0xff]  ;;  %v393_v7 = vld [vmem:[%s2844_s3 + $0x90] sm:$0xff]  ;;  %v426_v8 = vld [vmem:[%s2844_s3 + $0x198] sm:$0xff] }
  0x1c   :  { %1463 = vmatprep.subr.mxu1 %v433_v43  ;;  %1433 = vmatpush3.msra.mxu0 %v383_v48  ;;  %v377_v9 = vld [vmem:[%s2844_s3 + $0x10] sm:$0xff]  ;;  %v410_v10 = vld [vmem:[%s2844_s3 + $0x118] sm:$0xff]  ;;  %v392_v11 = vld [vmem:[%s2844_s3 + $0x88] sm:$0xff] }
  0x1d   :  { %1464 = vmatpush3.msra.mxu1 %v417_v45  ;;  %1434 = vmatprep.subr.mxu0 %v398_v50  ;;  %v425_v12 = vld [vmem:[%s2844_s3 + $0x190] sm:$0xff]  ;;  %v376_v13 = vld [vmem:[%s2844_s3 + $0x8] sm:$0xff]  ;;  %v391_v15 = vld [vmem:[%s2844_s3 + $0x80] sm:$0xff] }
  0x1e   :  { %1465 = vmatprep.subr.mxu1 %v432_v47  ;;  %1435 = vmatpush3.msra.mxu0 %v382_v52  ;;  %v409_v14 = vld [vmem:[%s2844_s3 + $0x110] sm:$0xff]  ;;  %v424_v16 = vld [vmem:[%s2844_s3 + $0x188] sm:$0xff]  ;;  %v375_v17 = vld [vmem:[%s2844_s3] sm:$0xff] }
  0x1f   :  { %1466 = vmatpush3.msra.mxu1 %v416_v49  ;;  %1436 = vmatprep.subr.mxu0 %v397_v54  ;;  %v408_v18 = vld [vmem:[%s2844_s3 + $0x108] sm:$0xff]  ;;  %v423_v19 = vld [vmem:[%s2844_s3 + $0x180] sm:$0xff]  ;;  %v470_v20 = vld [vmem:[%s2844_s3 + $0x2f8] sm:$0xff] }
  0x20   :  { %1467 = vmatprep.subr.mxu1 %v431_v51  ;;  %1437 = vmatpush3.msra.mxu0 %v381_v56  ;;  %v407_v21 = vld [vmem:[%s2844_s3 + $0x100] sm:$0xff]  ;;  %v502_v22 = vld [vmem:[%s2844_s3 + $0x3f8] sm:$0xff]  ;;  %v453_v25 = vld [vmem:[%s2844_s3 + $0x270] sm:$0xff] }
  0x21   :  { %1468 = vmatpush3.msra.mxu1 %v415_v53  ;;  %1438 = vmatprep.subr.mxu0 %v396_v58  ;;  %v501_v29 = vld [vmem:[%s2844_s3 + $0x3f0] sm:$0xff]  ;;  %v498_v41 = vld [vmem:[%s2844_s3 + $0x3d8] sm:$0xff] }
  0x22   :  { %1469 = vmatprep.subr.mxu1 %v430_v55  ;;  %1439 = vmatpush3.msra.mxu0 %v380_v60 }
  0x23   :  { %1470 = vmatpush3.msra.mxu1 %v414_v57  ;;  %1440 = vmatprep.subr.mxu0 %v395_v62 }
  0x24   :  { %1471 = vmatprep.subr.mxu1 %v429_v59  ;;  %1441 = vmatpush3.msra.mxu0 %v379_v0 }
  0x25   :  { %1472 = vmatpush3.msra.mxu1 %v413_v61  ;;  %1442 = vmatprep.subr.mxu0 %v394_v2  ;;  %v1809_v61 = vmov 1983009808  }
  0x26   :  { %1473 = vmatprep.subr.mxu1 %v428_v63  ;;  %1443 = vmatpush3.msra.mxu0 %v378_v4  ;;  %v644_v62 = vunpack.c.l.s4 %v1809_v61  ;;  %v493_v61 = vld [vmem:[%s2844_s3 + $0x3b0] sm:$0xff] }
  0x27   :  { %1474 = vmatpush3.msra.mxu1 %v412_v1  ;;  %1444 = vmatprep.subr.mxu0 %v393_v7 }
  0x28   :  { %1475 = vmatprep.subr.mxu1 %v427_v3  ;;  %1445 = vmatpush3.msra.mxu0 %v377_v9 }
  0x29   :  { %1476 = vmatpush3.msra.mxu1 %v411_v6  ;;  %1446 = vmatprep.subr.mxu0 %v392_v11 }
  0x2a   :  { %1477 = vmatprep.subr.mxu1 %v426_v8  ;;  %1447 = vmatpush3.msra.mxu0 %v376_v13 }
  0x2b   :  { %1478 = vmatpush3.msra.mxu1 %v410_v10  ;;  %1448 = vmatprep.subr.mxu0 %v391_v15  ;;  %v645_v10 = vunpack.c.0.s8 %v644_v62  ;;  %v444_v62 = vld [vmem:[%s2844_s3 + $0x228] sm:$0xff] }
  0x2c   :  { %1479 = vmatprep.subr.mxu1 %v425_v12  ;;  %1449 = vmatpush3.msra.mxu0 %v375_v17 }
  0x2d   :  { %1480 = vmatpush3.msra.mxu1 %v409_v14  ;;  %1488 = vmatprep.subr.mxu0 %v470_v20  ;;  %v2154_v11 = vsub.s32 %v645_v10, %v223_v30  ;;  %v454_v20 = vld [vmem:[%s2844_s3 + $0x278] sm:$0xff]  ;;  %v452_v30 = vld [vmem:[%s2844_s3 + $0x268] sm:$0xff] }
  0x2e   :  { %1481 = vmatprep.subr.mxu1 %v424_v16  ;;  %v490_v10 = vld [vmem:[%s2844_s3 + $0x398] sm:$0xff] }
  0x2f   :  { %1482 = vmatpush3.msra.mxu1 %v408_v18 }
  0x30   :  { %1483 = vmatprep.subr.mxu1 %v423_v19 }
  0x31   :  { %1484 = vmatpush3.msra.mxu1 %v407_v21 }
  0x32   :  { %1523 = vmatprep.subr.mxu1 %v502_v22  ;;  %v469_v22 = vld [vmem:[%s2844_s3 + $0x2f0] sm:$0xff] }
  0x81   :  { %v51_v26 = vpop.permute.xlu0 %50 }
  0xca   :  { %v136_v27 = vpop.f32.mrf.mxu1 }
  0xcb   :  { %v137_v28 = vadd.f32 %v136_v27, %v51_v26  ;;  %v468_v27 = vld [vmem:[%s2844_s3 + $0x2e8] sm:$0xff] }
  0xcc   :  { %v138_v31 = vpop.f32.mrf.mxu1 }
  0xcd   :  { %v212_v32 = vmax.f32 %v137_v28, 0.0  ;;  %v139_v33 = vadd.f32 %v138_v31, %v51_v26  ;;  %v485_v31 = vld [vmem:[%s2844_s3 + $0x370] sm:$0xff] }
  0xcf   :  { %v213_v34 = vmax.f32 %v139_v33, 0.0  ;;  %v500_v33 = vld [vmem:[%s2844_s3 + $0x3e8] sm:$0xff] }
  0xd1   :  { %v218_v36 = vcombine.low %v212_v32, %v213_v34  ;;  %v258_v37 = vcombine.high %v212_v32, %v213_v34  ;;  %v467_v32 = vld [vmem:[%s2844_s3 + $0x2e0] sm:$0xff] }
  0xd2   :  { %v207_v38 = vpop.f32.mrf.mxu1  ;;  %v451_v34 = vld [vmem:[%s2844_s3 + $0x260] sm:$0xff] }
  0xd3   :  { %v225_v39 = vrot.slane %v218_v36, %v224_v35  ;;  %v265_v40 = vrot.slane %v258_v37, %v224_v35  ;;  %v208_v42 = vadd.f32 %v207_v38, %v51_v26  ;;  %v466_v36 = vld [vmem:[%s2844_s3 + $0x2d8] sm:$0xff]  ;;  %v499_v37 = vld [vmem:[%s2844_s3 + $0x3e0] sm:$0xff] }
  0xd4   :  { %v209_v43 = vpop.f32.mrf.mxu1  ;;  %v450_v38 = vld [vmem:[%s2844_s3 + $0x258] sm:$0xff] }
  0xd5   :  { %v232_v44 = vrot.slane %v225_v39, %v224_v35  ;;  %v239_v45 = vcombine.high %v225_v39, %v225_v39  ;;  %v272_v46 = vrot.slane %v265_v40, %v224_v35  ;;  %v276_v47 = vcombine.high %v265_v40, %v265_v40  ;;  %v483_v39 = vld [vmem:[%s2844_s3 + $0x360] sm:$0xff]  ;;  %v465_v40 = vld [vmem:[%s2844_s3 + $0x2d0] sm:$0xff] }
  0xd6   :  { %v210_v48 = vadd.f32 %v209_v43, %v51_v26  ;;  %v214_v53 = vmax.f32 %v208_v42, 0.0  ;;  %v486_v26 = vld [vmem:[%s2844_s3 + $0x378] sm:$0xff]  ;;  %v449_v42 = vld [vmem:[%s2844_s3 + $0x250] sm:$0xff] }
  0xd7   :  { %238 = vst.msk [vmem:[#allocation2] ss:$2 sm:$0x3] %vm2118_vm2, %v232_v44  ;;  %v246_v49 = vrot.slane %v239_v45, %v224_v35  ;;  %v250_v50 = vcombine.high %v232_v44, %v232_v44  ;;  %275 = vst.msk [vmem:[#allocation2 + $0x10] ss:$2 sm:$0x3] %vm2118_vm2, %v272_v46  ;;  %v283_v51 = vrot.slane %v276_v47, %v224_v35 }
  0xd8   :  { %v287_v52 = vcombine.high %v272_v46, %v272_v46  ;;  %v215_v54 = vmax.f32 %v210_v48, 0.0  ;;  %v482_v43 = vld [vmem:[%s2844_s3 + $0x358] sm:$0xff]  ;;  %v464_v44 = vld [vmem:[%s2844_s3 + $0x2c8] sm:$0xff]  ;;  %v497_v45 = vld [vmem:[%s2844_s3 + $0x3d0] sm:$0xff] }
  0xd9   :  { %249 = vst.msk [vmem:[#allocation2 + $0x4] ss:$2 sm:$0x3] %vm2118_vm2, %v246_v49  ;;  %253 = vst.msk [vmem:[#allocation2 + $0x8] ss:$2 sm:$0x3] %vm2118_vm2, %v250_v50  ;;  %v254_v55 = vcombine.high %v246_v49, %v246_v49  ;;  %v291_v56 = vcombine.high %v283_v51, %v283_v51 }
  0xda   :  { %286 = vst.msk [vmem:[#allocation2 + $0x14] ss:$2 sm:$0x3] %vm2118_vm2, %v283_v51  ;;  %290 = vst.msk [vmem:[#allocation2 + $0x18] ss:$2 sm:$0x3] %vm2118_vm2, %v287_v52  ;;  %v297_v57 = vcombine.low %v214_v53, %v215_v54  ;;  %v334_v58 = vcombine.high %v214_v53, %v215_v54 }
  0xdb   :  { %257 = vst.msk [vmem:[#allocation2 + $0xc] ss:$2 sm:$0x3] %vm2118_vm2, %v254_v55  ;;  %294 = vst.msk [vmem:[#allocation2 + $0x1c] ss:$2 sm:$0x3] %vm2118_vm2, %v291_v56 }
  0xdc   :  { %v304_v59 = vrot.slane %v297_v57, %v224_v35  ;;  %v341_v60 = vrot.slane %v334_v58, %v224_v35  ;;  %v448_v46 = vld [vmem:[%s2844_s3 + $0x248] sm:$0xff]  ;;  %v481_v47 = vld [vmem:[%s2844_s3 + $0x350] sm:$0xff]  ;;  %v463_v48 = vld [vmem:[%s2844_s3 + $0x2c0] sm:$0xff] }
  0xdd   :  { %v496_v49 = vld [vmem:[%s2844_s3 + $0x3c8] sm:$0xff]  ;;  %v447_v50 = vld [vmem:[%s2844_s3 + $0x240] sm:$0xff]  ;;  %v462_v52 = vld [vmem:[%s2844_s3 + $0x2b8] sm:$0xff] }
  0xde   :  { %v311_v63 = vrot.slane %v304_v59, %v224_v35  ;;  %v315_v0 = vcombine.high %v304_v59, %v304_v59  ;;  %v348_v1 = vrot.slane %v341_v60, %v224_v35  ;;  %v352_v2 = vcombine.high %v341_v60, %v341_v60  ;;  %v480_v51 = vld [vmem:[%s2844_s3 + $0x348] sm:$0xff]  ;;  %v495_v53 = vld [vmem:[%s2844_s3 + $0x3c0] sm:$0xff]  ;;  %v446_v54 = vld [vmem:[%s2844_s3 + $0x238] sm:$0xff] }
  0xdf   :  { %v479_v55 = vld [vmem:[%s2844_s3 + $0x340] sm:$0xff]  ;;  %v461_v56 = vld [vmem:[%s2844_s3 + $0x2b0] sm:$0xff]  ;;  %v494_v57 = vld [vmem:[%s2844_s3 + $0x3b8] sm:$0xff] }
  0xe0   :  { %314 = vst.msk [vmem:[#allocation2 + $0x1] ss:$2 sm:$0x3] %vm2118_vm2, %v311_v63  ;;  %v322_v3 = vrot.slane %v315_v0, %v224_v35  ;;  %v326_v4 = vcombine.high %v311_v63, %v311_v63  ;;  %351 = vst.msk [vmem:[#allocation2 + $0x11] ss:$2 sm:$0x3] %vm2118_vm2, %v348_v1  ;;  %v359_v6 = vrot.slane %v352_v2, %v224_v35 }
  0xe1   :  { %v363_v7 = vcombine.high %v348_v1, %v348_v1  ;;  %v484_v35 = vld [vmem:[%s2844_s3 + $0x368] sm:$0xff]  ;;  %v445_v58 = vld [vmem:[%s2844_s3 + $0x230] sm:$0xff]  ;;  %v478_v59 = vld [vmem:[%s2844_s3 + $0x338] sm:$0xff] }
  0xe2   :  { %325 = vst.msk [vmem:[#allocation2 + $0x5] ss:$2 sm:$0x3] %vm2118_vm2, %v322_v3  ;;  %329 = vst.msk [vmem:[#allocation2 + $0x9] ss:$2 sm:$0x3] %vm2118_vm2, %v326_v4  ;;  %v330_v8 = vcombine.high %v322_v3, %v322_v3  ;;  %v367_v9 = vcombine.high %v359_v6, %v359_v6 }
  0xe3   :  { %362 = vst.msk [vmem:[#allocation2 + $0x15] ss:$2 sm:$0x3] %vm2118_vm2, %v359_v6  ;;  %366 = vst.msk [vmem:[#allocation2 + $0x19] ss:$2 sm:$0x3] %vm2118_vm2, %v363_v7 }
  0xe4   :  { %333 = vst.msk [vmem:[#allocation2 + $0xd] ss:$2 sm:$0x3] %vm2118_vm2, %v330_v8  ;;  %370 = vst.msk [vmem:[#allocation2 + $0x1d] ss:$2 sm:$0x3] %vm2118_vm2, %v367_v9 }
  0xe5   :  { %v460_v60 = vld [vmem:[%s2844_s3 + $0x2a8] sm:$0xff]  ;;  %v477_v63 = vld [vmem:[%s2844_s3 + $0x330] sm:$0xff]  ;;  %v459_v0 = vld [vmem:[%s2844_s3 + $0x2a0] sm:$0xff] }
  0xe6   :  { %v492_v1 = vld [vmem:[%s2844_s3 + $0x3a8] sm:$0xff]  ;;  %v443_v2 = vld [vmem:[%s2844_s3 + $0x220] sm:$0xff]  ;;  %v458_v4 = vld [vmem:[%s2844_s3 + $0x298] sm:$0xff] }
  0xe7   :  { %v476_v3 = vld [vmem:[%s2844_s3 + $0x328] sm:$0xff]  ;;  %v491_v6 = vld [vmem:[%s2844_s3 + $0x3a0] sm:$0xff]  ;;  %v442_v7 = vld [vmem:[%s2844_s3 + $0x218] sm:$0xff] }
  0xe8   :  { %v475_v8 = vld [vmem:[%s2844_s3 + $0x320] sm:$0xff]  ;;  %v457_v9 = vld [vmem:[%s2844_s3 + $0x290] sm:$0xff] }
  0xe9   :  { %v371_v12 = vld [vmem:[#allocation2] sm:$0xff] }
  0xea   :  { %v642_v13 = vcombine.high %v371_v12, %v371_v12  ;;  %v649_v14 = vrot.slane %v371_v12, %v2154_v11  ;;  %v441_v12 = vld [vmem:[%s2844_s3 + $0x210] sm:$0xff] }
  0xeb   :  { %v372_v15 = vld [vmem:[#allocation2 + $0x8] sm:$0xff] }
  0xec   :  { %v657_v16 = vcombine.high %v649_v14, %v649_v14  ;;  %v656_v17 = vrot.slane %v642_v13, %v2154_v11  ;;  %v2159_v18 = vrot.slane %v372_v15, %v2154_v11  ;;  %v659_v19 = vcombine.high %v372_v15, %v372_v15  ;;  %v474_v13 = vld [vmem:[%s2844_s3 + $0x318] sm:$0xff]  ;;  %v456_v15 = vld [vmem:[%s2844_s3 + $0x288] sm:$0xff] }
  0xee   :  { %790 = vmatprep.mubr.f32.mxu0 %v657_v16  ;;  %v658_v21 = vcombine.high %v656_v17, %v656_v17  ;;  %v674_v23 = vcombine.high %v2159_v18, %v2159_v18  ;;  %v2170_v24 = vrot.slane %v659_v19, %v2154_v11  ;;  %v489_v16 = vld [vmem:[%s2844_s3 + $0x390] sm:$0xff] }
  0xef   :  { %791 = vmatmul.mubr.f32.vlgmr.msra.gmra.mxu0 %v649_v14  ;;  %v373_v14 = vld [vmem:[#allocation2 + $0x10] sm:$0xff] }
  0xf0   :  { %1489 = vmatpush3.msra.mxu0 %v454_v20  ;;  %860 = vmatprep.mubr.f32.mxu1 %v658_v21  ;;  %v675_v28 = vcombine.high %v2170_v24, %v2170_v24  ;;  %v473_v19 = vld [vmem:[%s2844_s3 + $0x310] sm:$0xff]  ;;  %v455_v20 = vld [vmem:[%s2844_s3 + $0x280] sm:$0xff]  ;;  %v488_v21 = vld [vmem:[%s2844_s3 + $0x388] sm:$0xff] }
  0xf1   :  { %1490 = vmatprep.subr.mxu0 %v469_v22  ;;  %930 = vmatprep.mubr.f32.mxu0 %v674_v23  ;;  %v676_v22 = vcombine.high %v373_v14, %v373_v14  ;;  %v439_v23 = vld [vmem:[%s2844_s3 + $0x200] sm:$0xff] }
  0xf2   :  { %861 = vmatmul.mubr.f32.vlgmr.msra.gmra.mxu1 %v656_v17  ;;  %1491 = vmatpush3.msra.mxu0 %v453_v25  ;;  %v440_v17 = vld [vmem:[%s2844_s3 + $0x208] sm:$0xff] }
  0xf3   :  { %1524 = vmatpush3.msra.mxu1 %v486_v26  ;;  %1492 = vmatprep.subr.mxu0 %v468_v27  ;;  %v472_v25 = vld [vmem:[%s2844_s3 + $0x308] sm:$0xff]  ;;  %v2349_v26 = vrot.slane %v373_v14, %v2154_v11  ;;  %v487_v27 = vld [vmem:[%s2844_s3 + $0x380] sm:$0xff]  ;;  %v522_v14 = vld [vmem:[%s2844_s3 + $0x498] sm:$0xff] }
  0xf4   :  { %1525 = vmatprep.subr.mxu1 %v501_v29  ;;  %1000 = vmatprep.mubr.f32.mxu1 %v675_v28  ;;  %v534_v28 = vld [vmem:[%s2844_s3 + $0x4f8] sm:$0xff]  ;;  %v471_v29 = vld [vmem:[%s2844_s3 + $0x300] sm:$0xff] }
  0xf5   :  { %1493 = vmatpush3.msra.mxu0 %v452_v30  ;;  %1526 = vmatpush3.msra.mxu1 %v485_v31  ;;  %v518_v30 = vld [vmem:[%s2844_s3 + $0x478] sm:$0xff]  ;;  %v2364_v31 = vrot.slane %v676_v22, %v2154_v11 }
  0xf6   :  { %1494 = vmatprep.subr.mxu0 %v467_v32  ;;  %1527 = vmatprep.subr.mxu1 %v500_v33  ;;  %v691_v32 = vcombine.high %v2349_v26, %v2349_v26  ;;  %v533_v33 = vld [vmem:[%s2844_s3 + $0x4f0] sm:$0xff]  ;;  %v538_v22 = vld [vmem:[%s2844_s3 + $0x518] sm:$0xff] }
  0xf7   :  { %1495 = vmatpush3.msra.mxu0 %v451_v34  ;;  %1528 = vmatpush3.msra.mxu1 %v484_v35  ;;  %v566_v34 = vld [vmem:[%s2844_s3 + $0x5f8] sm:$0xff]  ;;  %v517_v35 = vld [vmem:[%s2844_s3 + $0x470] sm:$0xff] }
  0xf8   :  { %1496 = vmatprep.subr.mxu0 %v466_v36  ;;  %1529 = vmatprep.subr.mxu1 %v499_v37  ;;  %v692_v36 = vcombine.high %v2364_v31, %v2364_v31  ;;  %v532_v37 = vld [vmem:[%s2844_s3 + $0x4e8] sm:$0xff] }
  0xf9   :  { %1497 = vmatpush3.msra.mxu0 %v450_v38  ;;  %1530 = vmatpush3.msra.mxu1 %v483_v39  ;;  %v565_v38 = vld [vmem:[%s2844_s3 + $0x5f0] sm:$0xff]  ;;  %v516_v39 = vld [vmem:[%s2844_s3 + $0x468] sm:$0xff] }
  0xfa   :  { %1498 = vmatprep.subr.mxu0 %v465_v40  ;;  %1531 = vmatprep.subr.mxu1 %v498_v41  ;;  %v531_v40 = vld [vmem:[%s2844_s3 + $0x4e0] sm:$0xff]  ;;  %v564_v41 = vld [vmem:[%s2844_s3 + $0x5e8] sm:$0xff] }
  0xfb   :  { %1499 = vmatpush3.msra.mxu0 %v449_v42  ;;  %1532 = vmatpush3.msra.mxu1 %v482_v43  ;;  %v515_v42 = vld [vmem:[%s2844_s3 + $0x460] sm:$0xff]  ;;  %v548_v43 = vld [vmem:[%s2844_s3 + $0x568] sm:$0xff] }
  0xfc   :  { %1500 = vmatprep.subr.mxu0 %v464_v44  ;;  %1533 = vmatprep.subr.mxu1 %v497_v45  ;;  %v530_v44 = vld [vmem:[%s2844_s3 + $0x4d8] sm:$0xff]  ;;  %v563_v45 = vld [vmem:[%s2844_s3 + $0x5e0] sm:$0xff] }
  0xfd   :  { %1501 = vmatpush3.msra.mxu0 %v448_v46  ;;  %1534 = vmatpush3.msra.mxu1 %v481_v47  ;;  %v514_v46 = vld [vmem:[%s2844_s3 + $0x458] sm:$0xff]  ;;  %v547_v47 = vld [vmem:[%s2844_s3 + $0x560] sm:$0xff] }
  0xfe   :  { %1502 = vmatprep.subr.mxu0 %v463_v48  ;;  %1535 = vmatprep.subr.mxu1 %v496_v49  ;;  %v529_v48 = vld [vmem:[%s2844_s3 + $0x4d0] sm:$0xff]  ;;  %v562_v49 = vld [vmem:[%s2844_s3 + $0x5d8] sm:$0xff] }
  0xff   :  { %1503 = vmatpush3.msra.mxu0 %v447_v50  ;;  %1536 = vmatpush3.msra.mxu1 %v480_v51  ;;  %v513_v50 = vld [vmem:[%s2844_s3 + $0x450] sm:$0xff]  ;;  %v546_v51 = vld [vmem:[%s2844_s3 + $0x558] sm:$0xff] }
 0x100   :  { %1504 = vmatprep.subr.mxu0 %v462_v52  ;;  %1537 = vmatprep.subr.mxu1 %v495_v53  ;;  %v528_v52 = vld [vmem:[%s2844_s3 + $0x4c8] sm:$0xff]  ;;  %v561_v53 = vld [vmem:[%s2844_s3 + $0x5d0] sm:$0xff] }
 0x101   :  { %1505 = vmatpush3.msra.mxu0 %v446_v54  ;;  %1538 = vmatpush3.msra.mxu1 %v479_v55  ;;  %v512_v54 = vld [vmem:[%s2844_s3 + $0x448] sm:$0xff]  ;;  %v545_v55 = vld [vmem:[%s2844_s3 + $0x550] sm:$0xff] }
 0x102   :  { %1506 = vmatprep.subr.mxu0 %v461_v56  ;;  %1539 = vmatprep.subr.mxu1 %v494_v57  ;;  %v527_v56 = vld [vmem:[%s2844_s3 + $0x4c0] sm:$0xff]  ;;  %v560_v57 = vld [vmem:[%s2844_s3 + $0x5c8] sm:$0xff] }
 0x103   :  { %1507 = vmatpush3.msra.mxu0 %v445_v58  ;;  %1540 = vmatpush3.msra.mxu1 %v478_v59  ;;  %v511_v58 = vld [vmem:[%s2844_s3 + $0x440] sm:$0xff]  ;;  %v544_v59 = vld [vmem:[%s2844_s3 + $0x548] sm:$0xff] }
 0x104   :  { %1508 = vmatprep.subr.mxu0 %v460_v60  ;;  %1541 = vmatprep.subr.mxu1 %v493_v61  ;;  %v526_v60 = vld [vmem:[%s2844_s3 + $0x4b8] sm:$0xff]  ;;  %v559_v61 = vld [vmem:[%s2844_s3 + $0x5c0] sm:$0xff] }
 0x105   :  { %1509 = vmatpush3.msra.mxu0 %v444_v62  ;;  %1542 = vmatpush3.msra.mxu1 %v477_v63  ;;  %v510_v62 = vld [vmem:[%s2844_s3 + $0x438] sm:$0xff]  ;;  %v543_v63 = vld [vmem:[%s2844_s3 + $0x540] sm:$0xff] }
 0x106   :  { %1510 = vmatprep.subr.mxu0 %v459_v0  ;;  %1543 = vmatprep.subr.mxu1 %v492_v1  ;;  %v525_v0 = vld [vmem:[%s2844_s3 + $0x4b0] sm:$0xff]  ;;  %v558_v1 = vld [vmem:[%s2844_s3 + $0x5b8] sm:$0xff] }
 0x107   :  { %1511 = vmatpush3.msra.mxu0 %v443_v2  ;;  %1544 = vmatpush3.msra.mxu1 %v476_v3  ;;  %v509_v2 = vld [vmem:[%s2844_s3 + $0x430] sm:$0xff]  ;;  %v542_v3 = vld [vmem:[%s2844_s3 + $0x538] sm:$0xff] }
 0x108   :  { %1512 = vmatprep.subr.mxu0 %v458_v4  ;;  %1545 = vmatprep.subr.mxu1 %v491_v6  ;;  %v524_v4 = vld [vmem:[%s2844_s3 + $0x4a8] sm:$0xff]  ;;  %v557_v6 = vld [vmem:[%s2844_s3 + $0x5b0] sm:$0xff] }
 0x109   :  { %1513 = vmatpush3.msra.mxu0 %v442_v7  ;;  %1546 = vmatpush3.msra.mxu1 %v475_v8  ;;  %v508_v7 = vld [vmem:[%s2844_s3 + $0x428] sm:$0xff]  ;;  %v541_v8 = vld [vmem:[%s2844_s3 + $0x530] sm:$0xff] }
 0x10a   :  { %1514 = vmatprep.subr.mxu0 %v457_v9  ;;  %1547 = vmatprep.subr.mxu1 %v490_v10  ;;  %v523_v9 = vld [vmem:[%s2844_s3 + $0x4a0] sm:$0xff]  ;;  %v556_v10 = vld [vmem:[%s2844_s3 + $0x5a8] sm:$0xff] }
 0x10b   :  { %1515 = vmatpush3.msra.mxu0 %v441_v12  ;;  %1548 = vmatpush3.msra.mxu1 %v474_v13  ;;  %v507_v12 = vld [vmem:[%s2844_s3 + $0x420] sm:$0xff]  ;;  %v540_v13 = vld [vmem:[%s2844_s3 + $0x528] sm:$0xff] }
 0x10c   :  { %1516 = vmatprep.subr.mxu0 %v456_v15  ;;  %1549 = vmatprep.subr.mxu1 %v489_v16  ;;  %v555_v15 = vld [vmem:[%s2844_s3 + $0x5a0] sm:$0xff]  ;;  %v506_v16 = vld [vmem:[%s2844_s3 + $0x418] sm:$0xff] }
 0x10d   :  { %1517 = vmatpush3.msra.mxu0 %v440_v17  ;;  %1550 = vmatpush3.msra.mxu1 %v473_v19  ;;  %v539_v17 = vld [vmem:[%s2844_s3 + $0x520] sm:$0xff]  ;;  %v521_v19 = vld [vmem:[%s2844_s3 + $0x490] sm:$0xff] }
 0x10e   :  { %1518 = vmatprep.subr.mxu0 %v455_v20  ;;  %1551 = vmatprep.subr.mxu1 %v488_v21  ;;  %v554_v20 = vld [vmem:[%s2844_s3 + $0x598] sm:$0xff]  ;;  %v505_v21 = vld [vmem:[%s2844_s3 + $0x410] sm:$0xff] }
 0x10f   :  { %1519 = vmatpush3.msra.mxu0 %v439_v23  ;;  %1552 = vmatpush3.msra.mxu1 %v472_v25  ;;  %v374_v23 = vld [vmem:[#allocation2 + $0x18] sm:$0xff]  ;;  %v520_v25 = vld [vmem:[%s2844_s3 + $0x488] sm:$0xff] }
 0x110   :  { %931 = vmatmul.mubr.f32.vlgmr.msra.gmra.mxu0 %v2159_v18  ;;  %1553 = vmatprep.subr.mxu1 %v487_v27  ;;  %v550_v18 = vld [vmem:[%s2844_s3 + $0x578] sm:$0xff]  ;;  %v553_v27 = vld [vmem:[%s2844_s3 + $0x590] sm:$0xff] }
 0x111   :  { %1558 = vmatprep.subr.mxu0 %v534_v28  ;;  %1554 = vmatpush3.msra.mxu1 %v471_v29  ;;  %v504_v28 = vld [vmem:[%s2844_s3 + $0x408] sm:$0xff]  ;;  %v537_v29 = vld [vmem:[%s2844_s3 + $0x510] sm:$0xff] }
 0x112   :  { %1559 = vmatpush3.msra.mxu0 %v518_v30  ;;  %1070 = vmatprep.mubr.f32.mxu0 %v691_v32  ;;  %v519_v30 = vld [vmem:[%s2844_s3 + $0x480] sm:$0xff]  ;;  %v552_v32 = vld [vmem:[%s2844_s3 + $0x588] sm:$0xff] }
 0x113   :  { %1001 = vmatmul.mubr.f32.vlgmr.msra.gmra.mxu1 %v2170_v24  ;;  %1560 = vmatprep.subr.mxu0 %v533_v33  ;;  %v549_v24 = vld [vmem:[%s2844_s3 + $0x570] sm:$0xff]  ;;  %v693_v33 = vcombine.high %v374_v23, %v374_v23 }
 0x114   :  { %1593 = vmatprep.subr.mxu1 %v566_v34  ;;  %1561 = vmatpush3.msra.mxu0 %v517_v35  ;;  %v503_v34 = vld [vmem:[%s2844_s3 + $0x400] sm:$0xff]  ;;  %v536_v35 = vld [vmem:[%s2844_s3 + $0x508] sm:$0xff] }
 0x115   :  { %1594 = vmatpush3.msra.mxu1 %v550_v18  ;;  %1140 = vmatprep.mubr.f32.mxu1 %v692_v36  ;;  %v2553_v18 = vrot.slane %v374_v23, %v2154_v11  ;;  %v551_v36 = vld [vmem:[%s2844_s3 + $0x580] sm:$0xff] }
 0x116   :  { %1562 = vmatprep.subr.mxu0 %v532_v37  ;;  %1595 = vmatprep.subr.mxu1 %v565_v38  ;;  %v598_v37 = vld [vmem:[%s2844_s3 + $0x6f8] sm:$0xff]  ;;  %v535_v38 = vld [vmem:[%s2844_s3 + $0x500] sm:$0xff] }
 0x117   :  { %1563 = vmatpush3.msra.mxu0 %v516_v39  ;;  %1596 = vmatpush3.msra.mxu1 %v549_v24  ;;  %v582_v39 = vld [vmem:[%s2844_s3 + $0x678] sm:$0xff]  ;;  %v2568_v24 = vrot.slane %v693_v33, %v2154_v11  ;;  %v581_v11 = vld [vmem:[%s2844_s3 + $0x670] sm:$0xff]  ;;  %v619_v23 = vld [vmem:[%s2844_s3 + $0x7a0] sm:$0xff] }
 0x118   :  { %1564 = vmatprep.subr.mxu0 %v531_v40  ;;  %1597 = vmatprep.subr.mxu1 %v564_v41  ;;  %v708_v40 = vcombine.high %v2553_v18, %v2553_v18  ;;  %v597_v41 = vld [vmem:[%s2844_s3 + $0x6f0] sm:$0xff]  ;;  %v584_v33 = vld [vmem:[%s2844_s3 + $0x688] sm:$0xff] }
 0x119   :  { %1565 = vmatpush3.msra.mxu0 %v515_v42  ;;  %1598 = vmatpush3.msra.mxu1 %v548_v43  ;;  %v630_v42 = vld [vmem:[%s2844_s3 + $0x7f8] sm:$0xff]  ;;  %v709_v43 = vcombine.high %v2568_v24, %v2568_v24 }
 0x11a   :  { %1566 = vmatprep.subr.mxu0 %v530_v44  ;;  %1599 = vmatprep.subr.mxu1 %v563_v45  ;;  %v596_v44 = vld [vmem:[%s2844_s3 + $0x6e8] sm:$0xff]  ;;  %v629_v45 = vld [vmem:[%s2844_s3 + $0x7f0] sm:$0xff] }
 0x11b   :  { %1567 = vmatpush3.msra.mxu0 %v514_v46  ;;  %1600 = vmatpush3.msra.mxu1 %v547_v47  ;;  %v580_v46 = vld [vmem:[%s2844_s3 + $0x668] sm:$0xff]  ;;  %v595_v47 = vld [vmem:[%s2844_s3 + $0x6e0] sm:$0xff] }
 0x11c   :  { %1568 = vmatprep.subr.mxu0 %v529_v48  ;;  %1601 = vmatprep.subr.mxu1 %v562_v49  ;;  %v628_v48 = vld [vmem:[%s2844_s3 + $0x7e8] sm:$0xff]  ;;  %v579_v49 = vld [vmem:[%s2844_s3 + $0x660] sm:$0xff] }
 0x11d   :  { %1569 = vmatpush3.msra.mxu0 %v513_v50  ;;  %1602 = vmatpush3.msra.mxu1 %v546_v51  ;;  %v612_v50 = vld [vmem:[%s2844_s3 + $0x768] sm:$0xff]  ;;  %v594_v51 = vld [vmem:[%s2844_s3 + $0x6d8] sm:$0xff] }
 0x11e   :  { %1570 = vmatprep.subr.mxu0 %v528_v52  ;;  %1603 = vmatprep.subr.mxu1 %v561_v53  ;;  %v627_v52 = vld [vmem:[%s2844_s3 + $0x7e0] sm:$0xff]  ;;  %v578_v53 = vld [vmem:[%s2844_s3 + $0x658] sm:$0xff] }
 0x11f   :  { %1571 = vmatpush3.msra.mxu0 %v512_v54  ;;  %1604 = vmatpush3.msra.mxu1 %v545_v55  ;;  %v611_v54 = vld [vmem:[%s2844_s3 + $0x760] sm:$0xff]  ;;  %v593_v55 = vld [vmem:[%s2844_s3 + $0x6d0] sm:$0xff] }
 0x120   :  { %1572 = vmatprep.subr.mxu0 %v527_v56  ;;  %1605 = vmatprep.subr.mxu1 %v560_v57  ;;  %v626_v56 = vld [vmem:[%s2844_s3 + $0x7d8] sm:$0xff]  ;;  %v577_v57 = vld [vmem:[%s2844_s3 + $0x650] sm:$0xff] }
 0x121   :  { %1573 = vmatpush3.msra.mxu0 %v511_v58  ;;  %1606 = vmatpush3.msra.mxu1 %v544_v59  ;;  %v610_v58 = vld [vmem:[%s2844_s3 + $0x758] sm:$0xff]  ;;  %v592_v59 = vld [vmem:[%s2844_s3 + $0x6c8] sm:$0xff] }
 0x122   :  { %1574 = vmatprep.subr.mxu0 %v526_v60  ;;  %1607 = vmatprep.subr.mxu1 %v559_v61  ;;  %v625_v60 = vld [vmem:[%s2844_s3 + $0x7d0] sm:$0xff]  ;;  %v576_v61 = vld [vmem:[%s2844_s3 + $0x648] sm:$0xff] }
 0x123   :  { %1575 = vmatpush3.msra.mxu0 %v510_v62  ;;  %1608 = vmatpush3.msra.mxu1 %v543_v63  ;;  %v609_v62 = vld [vmem:[%s2844_s3 + $0x750] sm:$0xff]  ;;  %v591_v63 = vld [vmem:[%s2844_s3 + $0x6c0] sm:$0xff] }
 0x124   :  { %1576 = vmatprep.subr.mxu0 %v525_v0  ;;  %1609 = vmatprep.subr.mxu1 %v558_v1  ;;  %v624_v0 = vld [vmem:[%s2844_s3 + $0x7c8] sm:$0xff]  ;;  %v575_v1 = vld [vmem:[%s2844_s3 + $0x640] sm:$0xff] }
 0x125   :  { %1577 = vmatpush3.msra.mxu0 %v509_v2  ;;  %1610 = vmatpush3.msra.mxu1 %v542_v3  ;;  %v608_v2 = vld [vmem:[%s2844_s3 + $0x748] sm:$0xff]  ;;  %v590_v3 = vld [vmem:[%s2844_s3 + $0x6b8] sm:$0xff] }
 0x126   :  { %1578 = vmatprep.subr.mxu0 %v524_v4  ;;  %1611 = vmatprep.subr.mxu1 %v557_v6  ;;  %v623_v4 = vld [vmem:[%s2844_s3 + $0x7c0] sm:$0xff]  ;;  %v574_v6 = vld [vmem:[%s2844_s3 + $0x638] sm:$0xff] }
 0x127   :  { %1579 = vmatpush3.msra.mxu0 %v508_v7  ;;  %1612 = vmatpush3.msra.mxu1 %v541_v8  ;;  %v607_v7 = vld [vmem:[%s2844_s3 + $0x740] sm:$0xff]  ;;  %v589_v8 = vld [vmem:[%s2844_s3 + $0x6b0] sm:$0xff] }
 0x128   :  { %1580 = vmatprep.subr.mxu0 %v523_v9  ;;  %1613 = vmatprep.subr.mxu1 %v556_v10  ;;  %v622_v9 = vld [vmem:[%s2844_s3 + $0x7b8] sm:$0xff]  ;;  %v573_v10 = vld [vmem:[%s2844_s3 + $0x630] sm:$0xff] }
 0x129   :  { %1581 = vmatpush3.msra.mxu0 %v507_v12  ;;  %1614 = vmatpush3.msra.mxu1 %v540_v13  ;;  %v606_v12 = vld [vmem:[%s2844_s3 + $0x738] sm:$0xff]  ;;  %v588_v13 = vld [vmem:[%s2844_s3 + $0x6a8] sm:$0xff] }
 0x12a   :  { %1582 = vmatprep.subr.mxu0 %v522_v14  ;;  %1615 = vmatprep.subr.mxu1 %v555_v15  ;;  %v621_v14 = vld [vmem:[%s2844_s3 + $0x7b0] sm:$0xff]  ;;  %v572_v15 = vld [vmem:[%s2844_s3 + $0x628] sm:$0xff] }
 0x12b   :  { %1583 = vmatpush3.msra.mxu0 %v506_v16  ;;  %1616 = vmatpush3.msra.mxu1 %v539_v17  ;;  %v605_v16 = vld [vmem:[%s2844_s3 + $0x730] sm:$0xff]  ;;  %v587_v17 = vld [vmem:[%s2844_s3 + $0x6a0] sm:$0xff] }
 0x12c   :  { %1584 = vmatprep.subr.mxu0 %v521_v19  ;;  %1617 = vmatprep.subr.mxu1 %v554_v20  ;;  %v620_v19 = vld [vmem:[%s2844_s3 + $0x7a8] sm:$0xff]  ;;  %v571_v20 = vld [vmem:[%s2844_s3 + $0x620] sm:$0xff] }
 0x12d   :  { %1585 = vmatpush3.msra.mxu0 %v505_v21  ;;  %1618 = vmatpush3.msra.mxu1 %v538_v22  ;;  %v604_v21 = vld [vmem:[%s2844_s3 + $0x728] sm:$0xff]  ;;  %v586_v22 = vld [vmem:[%s2844_s3 + $0x698] sm:$0xff] }
 0x12e   :  { %1586 = vmatprep.subr.mxu0 %v520_v25  ;;  %1619 = vmatprep.subr.mxu1 %v553_v27  ;;  %v570_v25 = vld [vmem:[%s2844_s3 + $0x618] sm:$0xff]  ;;  %v603_v27 = vld [vmem:[%s2844_s3 + $0x720] sm:$0xff] }
 0x12f   :  { %1587 = vmatpush3.msra.mxu0 %v504_v28  ;;  %1620 = vmatpush3.msra.mxu1 %v537_v29  ;;  %v585_v28 = vld [vmem:[%s2844_s3 + $0x690] sm:$0xff]  ;;  %v618_v29 = vld [vmem:[%s2844_s3 + $0x798] sm:$0xff] }
 0x130   :  { %1588 = vmatprep.subr.mxu0 %v519_v30  ;;  %1621 = vmatprep.subr.mxu1 %v552_v32  ;;  %v569_v30 = vld [vmem:[%s2844_s3 + $0x610] sm:$0xff]  ;;  %v602_v32 = vld [vmem:[%s2844_s3 + $0x718] sm:$0xff] }
 0x131   :  { %1589 = vmatpush3.msra.mxu0 %v503_v34  ;;  %1622 = vmatpush3.msra.mxu1 %v536_v35  ;;  %v617_v34 = vld [vmem:[%s2844_s3 + $0x790] sm:$0xff]  ;;  %v568_v35 = vld [vmem:[%s2844_s3 + $0x608] sm:$0xff] }
 0x132   :  { %1071 = vmatmul.mubr.f32.vlgmr.msra.gmra.mxu0 %v2349_v26  ;;  %1623 = vmatprep.subr.mxu1 %v551_v36  ;;  %v614_v26 = vld [vmem:[%s2844_s3 + $0x778] sm:$0xff]  ;;  %v601_v36 = vld [vmem:[%s2844_s3 + $0x710] sm:$0xff] }
 0x133   :  { %1628 = vmatprep.subr.mxu0 %v598_v37  ;;  %1624 = vmatpush3.msra.mxu1 %v535_v38  ;;  %v583_v37 = vld [vmem:[%s2844_s3 + $0x680] sm:$0xff]  ;;  %v616_v38 = vld [vmem:[%s2844_s3 + $0x788] sm:$0xff] }
 0x134   :  { %1629 = vmatpush3.msra.mxu0 %v582_v39  ;;  %1210 = vmatprep.mubr.f32.mxu0 %v708_v40  ;;  %v567_v39 = vld [vmem:[%s2844_s3 + $0x600] sm:$0xff]  ;;  %v600_v40 = vld [vmem:[%s2844_s3 + $0x708] sm:$0xff] }
 0x135   :  { %1141 = vmatmul.mubr.f32.vlgmr.msra.gmra.mxu1 %v2364_v31  ;;  %1630 = vmatprep.subr.mxu0 %v597_v41  ;;  %v613_v31 = vld [vmem:[%s2844_s3 + $0x770] sm:$0xff]  ;;  %v615_v41 = vld [vmem:[%s2844_s3 + $0x780] sm:$0xff] }
 0x136   :  { %1663 = vmatprep.subr.mxu1 %v630_v42  ;;  %1631 = vmatpush3.msra.mxu0 %v581_v11  ;;  %v599_v42 = vld [vmem:[%s2844_s3 + $0x700] sm:$0xff]  ;;  %v1302_v11 = vld [vmem:[%s2846_s5 + $0x78] sm:$0xff] }
 0x137   :  { %1664 = vmatpush3.msra.mxu1 %v614_v26  ;;  %1280 = vmatprep.mubr.f32.mxu1 %v709_v43  ;;  %v1301_v26 = vld [vmem:[%s2846_s5 + $0x70] sm:$0xff]  ;;  %v1298_v43 = vld [vmem:[%s2846_s5 + $0x58] sm:$0xff] }
 0x138   :  { %1632 = vmatprep.subr.mxu0 %v596_v44  ;;  %1665 = vmatprep.subr.mxu1 %v629_v45  ;;  %v1297_v44 = vld [vmem:[%s2846_s5 + $0x50] sm:$0xff]  ;;  %v1296_v45 = vld [vmem:[%s2846_s5 + $0x48] sm:$0xff] }
 0x139   :  { %1633 = vmatpush3.msra.mxu0 %v580_v46  ;;  %1666 = vmatpush3.msra.mxu1 %v613_v31  ;;  %v1295_v46 = vld [vmem:[%s2846_s5 + $0x40] sm:$0xff]  ;;  %v1294_v31 = vld [vmem:[%s2846_s5 + $0x38] sm:$0xff] }
 0x13a   :  { %1634 = vmatprep.subr.mxu0 %v595_v47  ;;  %1667 = vmatprep.subr.mxu1 %v628_v48  ;;  %v1293_v47 = vld [vmem:[%s2846_s5 + $0x30] sm:$0xff]  ;;  %v1292_v48 = vld [vmem:[%s2846_s5 + $0x28] sm:$0xff] }
 0x13b   :  { %1635 = vmatpush3.msra.mxu0 %v579_v49  ;;  %1668 = vmatpush3.msra.mxu1 %v612_v50  ;;  %v1291_v49 = vld [vmem:[%s2846_s5 + $0x20] sm:$0xff]  ;;  %v1290_v50 = vld [vmem:[%s2846_s5 + $0x18] sm:$0xff] }
 0x13c   :  { %1636 = vmatprep.subr.mxu0 %v594_v51  ;;  %1669 = vmatprep.subr.mxu1 %v627_v52  ;;  %v1289_v51 = vld [vmem:[%s2846_s5 + $0x10] sm:$0xff]  ;;  %v1288_v52 = vld [vmem:[%s2846_s5 + $0x8] sm:$0xff] }
 0x13d   :  { %1637 = vmatpush3.msra.mxu0 %v578_v53  ;;  %1670 = vmatpush3.msra.mxu1 %v611_v54  ;;  %v1287_v53 = vld [vmem:[%s2846_s5] sm:$0xff] }
 0x13e   :  { %1638 = vmatprep.subr.mxu0 %v593_v55  ;;  %1671 = vmatprep.subr.mxu1 %v626_v56 }
 0x13f   :  { %1639 = vmatpush3.msra.mxu0 %v577_v57  ;;  %1672 = vmatpush3.msra.mxu1 %v610_v58 }
 0x140   :  { %1640 = vmatprep.subr.mxu0 %v592_v59  ;;  %1673 = vmatprep.subr.mxu1 %v625_v60  ;;  %v1416_v59 = vld [vmem:[%s2845_s4] ss:$0 sm:$0xff]  ;;  %s1811_s4 = smov [#allocation5]  }
 0x141   :  { %1641 = vmatpush3.msra.mxu0 %v576_v61  ;;  %1674 = vmatpush3.msra.mxu1 %v609_v62 }
 0x142   :  { %1642 = vmatprep.subr.mxu0 %v591_v63  ;;  %1675 = vmatprep.subr.mxu1 %v624_v0 }
 0x143   :  { %1643 = vmatpush3.msra.mxu0 %v575_v1  ;;  %1676 = vmatpush3.msra.mxu1 %v608_v2 }
 0x144   :  { %1644 = vmatprep.subr.mxu0 %v590_v3  ;;  %1677 = vmatprep.subr.mxu1 %v623_v4 }
 0x145   :  { %1645 = vmatpush3.msra.mxu0 %v574_v6  ;;  %1678 = vmatpush3.msra.mxu1 %v607_v7 }
 0x146   :  { %1646 = vmatprep.subr.mxu0 %v589_v8  ;;  %1679 = vmatprep.subr.mxu1 %v622_v9 }
 0x147   :  { %1647 = vmatpush3.msra.mxu0 %v573_v10  ;;  %1680 = vmatpush3.msra.mxu1 %v606_v12 }
 0x148   :  { %1648 = vmatprep.subr.mxu0 %v588_v13  ;;  %1681 = vmatprep.subr.mxu1 %v621_v14 }
 0x149   :  { %1649 = vmatpush3.msra.mxu0 %v572_v15  ;;  %1682 = vmatpush3.msra.mxu1 %v605_v16 }
 0x14a   :  { %1650 = vmatprep.subr.mxu0 %v587_v17  ;;  %1683 = vmatprep.subr.mxu1 %v620_v19 }
 0x14b   :  { %1651 = vmatpush3.msra.mxu0 %v571_v20  ;;  %1684 = vmatpush3.msra.mxu1 %v604_v21 }
 0x14c   :  { %1652 = vmatprep.subr.mxu0 %v586_v22  ;;  %1685 = vmatprep.subr.mxu1 %v619_v23 }
 0x14d   :  { %1653 = vmatpush3.msra.mxu0 %v570_v25  ;;  %1686 = vmatpush3.msra.mxu1 %v603_v27 }
 0x14e   :  { %1654 = vmatprep.subr.mxu0 %v585_v28  ;;  %1687 = vmatprep.subr.mxu1 %v618_v29 }
 0x14f   :  { %1655 = vmatpush3.msra.mxu0 %v569_v30  ;;  %1688 = vmatpush3.msra.mxu1 %v602_v32 }
 0x150   :  { %1656 = vmatprep.subr.mxu0 %v584_v33  ;;  %1689 = vmatprep.subr.mxu1 %v617_v34 }
 0x151   :  { %1657 = vmatpush3.msra.mxu0 %v568_v35  ;;  %1690 = vmatpush3.msra.mxu1 %v601_v36 }
 0x152   :  { %1658 = vmatprep.subr.mxu0 %v583_v37  ;;  %1691 = vmatprep.subr.mxu1 %v616_v38 }
 0x153   :  { %1659 = vmatpush3.msra.mxu0 %v567_v39  ;;  %1692 = vmatpush3.msra.mxu1 %v600_v40 }
 0x154   :  { %1211 = vmatmul.mubr.f32.vlgmr.msra.gmra.mxu0 %v2553_v18  ;;  %1693 = vmatprep.subr.mxu1 %v615_v41  ;;  %v1300_v18 = vld [vmem:[%s2846_s5 + $0x68] sm:$0xff] }
 0x155   :  { %1694 = vmatpush3.msra.mxu1 %v599_v42  ;;  %1715 = vmatprep.subr.mxu0 %v1806_v5 }
 0x156   :  { %1281 = vmatmul.mubr.f32.vlgmr.msra.gmra.mxu1 %v2568_v24  ;;  %1716 = vmatpush3.msra.mxu0 %v1302_v11  ;;  %v1299_v24 = vld [vmem:[%s2846_s5 + $0x60] sm:$0xff]  ;;  %s1398_s5 = sshll.u32 %s1811_s4, 4  ;;  %s1399_s5 = int_to_ptr.vmem [resolvable:$true] %s1398_s5 }
 0x157   :  { %1717 = vmatprep.subr.mxu0 %v1806_v5  ;;  %1747 = vmatprep.mubr.msk.f32.mxu0 %vm1810_vm3, %v1806_v5  ;;  %s1762_s11 = scalar_lea.vmem %s1399_s5, 32  ;;  %p1767_p1 = scmp.lt.s32.totalorder %s1399_s5, %s1399_s5 }
 0x158   :  { %1718 = vmatpush3.msra.mxu0 %v1301_v26  ;;  %p1763_p0 = scmp.ne.s32.totalorder %s1399_s5, %s1762_s11  ;;  %p1768_p2 = scmp.lt.s32.totalorder %s1762_s11, %s1762_s11 }
 0x159   :  { %1719 = vmatprep.subr.mxu0 %v1806_v5 }
 0x15a   :  { %1720 = vmatpush3.msra.mxu0 %v1300_v18  ;;  %p1769_p3 = por %p1768_p2, %p1767_p1 }
 0x15b   :  { %1721 = vmatprep.subr.mxu0 %v1806_v5 }
 0x15c   :  { %1722 = vmatpush3.msra.mxu0 %v1299_v24  ;;  %p1770_p4 = pnand %p1769_p3, %p1763_p0 }
 0x15d   :  { %1723 = vmatprep.subr.mxu0 %v1806_v5 }
 0x15e   :  { %1724 = vmatpush3.msra.mxu0 %v1298_v43 }
 0x15f   :  { %1725 = vmatprep.subr.mxu0 %v1806_v5 }
 0x160   :  { %1726 = vmatpush3.msra.mxu0 %v1297_v44 }
 0x161   :  { %1727 = vmatprep.subr.mxu0 %v1806_v5 }
 0x162   :  { %1728 = vmatpush3.msra.mxu0 %v1296_v45 }
 0x163   :  { %1729 = vmatprep.subr.mxu0 %v1806_v5 }
 0x164   :  { %1730 = vmatpush3.msra.mxu0 %v1295_v46 }
 0x165   :  { %1731 = vmatprep.subr.mxu0 %v1806_v5 }
 0x166   :  { %1732 = vmatpush3.msra.mxu0 %v1294_v31 }
 0x167   :  { %1733 = vmatprep.subr.mxu0 %v1806_v5 }
 0x168   :  { %1734 = vmatpush3.msra.mxu0 %v1293_v47 }
 0x169   :  { %1735 = vmatprep.subr.mxu0 %v1806_v5 }
 0x16a   :  { %1736 = vmatpush3.msra.mxu0 %v1292_v48 }
 0x16b   :  { %1737 = vmatprep.subr.mxu0 %v1806_v5 }
 0x16c   :  { %1738 = vmatpush3.msra.mxu0 %v1291_v49 }
 0x16d   :  { %1739 = vmatprep.subr.mxu0 %v1806_v5 }
 0x16e   :  { %1740 = vmatpush3.msra.mxu0 %v1290_v50 }
 0x16f   :  { %1741 = vmatprep.subr.mxu0 %v1806_v5 }
 0x170   :  { %1742 = vmatpush3.msra.mxu0 %v1289_v51 }
 0x171   :  { %1743 = vmatprep.subr.mxu0 %v1806_v5 }
 0x172   :  { %1744 = vmatpush3.msra.mxu0 %v1288_v52 }
 0x173   :  { %1745 = vmatprep.subr.mxu0 %v1806_v5 }
 0x174   :  { %1746 = vmatpush3.msra.mxu0 %v1287_v53 }
 0x1af   :  { %v1450_v54 = vpop.f32.mrf.mxu0 }
 0x1b1   :  { %v1451_v55 = vpop.f32.mrf.mxu0 }
 0x1b2   :  { %v1485_v56 = vpop.f32.mrf.mxu1  ;;  %v1452_v58 = vadd.f32 %v1451_v55, %v1450_v54 }
 0x1b4   :  { %v1486_v60 = vpop.f32.mrf.mxu1  ;;  %v793_v63 = vadd.f32 %v1452_v58, %v1416_v59 }
 0x1b5   :  { %v1487_v0 = vadd.f32 %v1486_v60, %v1485_v56 }
 0x1b7   :  { %v863_v4 = vadd.f32 %v1487_v0, %v793_v63 }
 0x1d0   :  { %v1520_v57 = vpop.f32.mrf.mxu0 }
 0x1d2   :  { %v1521_v61 = vpop.f32.mrf.mxu0 }
 0x1d3   :  { %v1555_v62 = vpop.f32.mrf.mxu1  ;;  %v1522_v2 = vadd.f32 %v1521_v61, %v1520_v57 }
 0x1d5   :  { %v1556_v3 = vpop.f32.mrf.mxu1  ;;  %v933_v7 = vadd.f32 %v1522_v2, %v863_v4 }
 0x1d6   :  { %v1557_v8 = vadd.f32 %v1556_v3, %v1555_v62 }
 0x1d8   :  { %v1003_v12 = vadd.f32 %v1557_v8, %v933_v7 }
 0x1f2   :  { %v1590_v1 = vpop.f32.mrf.mxu0 }
 0x1f4   :  { %v1591_v6 = vpop.f32.mrf.mxu0 }
 0x1f5   :  { %v1625_v5 = vpop.f32.mrf.mxu1  ;;  %v1592_v9 = vadd.f32 %v1591_v6, %v1590_v1 }
 0x1f7   :  { %v1626_v10 = vpop.f32.mrf.mxu1  ;;  %v1073_v13 = vadd.f32 %v1592_v9, %v1003_v12 }
 0x1f8   :  { %v1627_v14 = vadd.f32 %v1626_v10, %v1625_v5 }
 0x1fa   :  { %v1143_v19 = vadd.f32 %v1627_v14, %v1073_v13 }
 0x214   :  { %v1660_v15 = vpop.f32.mrf.mxu0 }
 0x216   :  { %v1661_v16 = vpop.f32.mrf.mxu0  ;;  %v1695_v17 = vpop.f32.mrf.mxu1 }
 0x217   :  { %v1662_v20 = vadd.f32 %v1661_v16, %v1660_v15 }
 0x218   :  { %v1696_v21 = vpop.f32.mrf.mxu1 }
 0x219   :  { %v1213_v22 = vadd.f32 %v1662_v20, %v1143_v19  ;;  %v1697_v23 = vadd.f32 %v1696_v21, %v1695_v17 }
 0x21b   :  { %v1283_v25 = vadd.f32 %v1697_v23, %v1213_v22 }
 0x21d   :  { %v1286_v27 = vmax.f32 %v1283_v25, 0.0 }
 0x21f   :  { %1380 = vst [vmem:[#allocation5] sm:$0x3] %v1286_v27  ;;  %1748 = vmatmul.mubr.f32.vlgmr.msra.gmra.mxu0 %v1286_v27 }
 0x220   :  { %1773 = shalt.err (!%p1770_p4)
}
 0x221   :  { %1401 = dma.vmem_to_hbm [thread:$0]  %s1399_s5, 32, %s2849_s8, [#allocation6]   ;;  %v1417_v28 = vld [vmem:[%s2847_s6] ss:$0 sm:$0xff] }
 0x222   :  { %s1812_s16 = smov [#allocation3]  }
 0x223   :  { %s1388_s17 = sshll.u32 %s1812_s16, 4  ;;  %s1389_s17 = int_to_ptr.vmem [resolvable:$true] %s1388_s17 }
 0x224   :  { %s1782_s18 = scalar_lea.vmem %s1389_s17, 32  ;;  %p1787_p6 = scmp.lt.s32.totalorder %s1389_s17, %s1389_s17 }
 0x225   :  { %p1783_p5 = scmp.ne.s32.totalorder %s1389_s17, %s1782_s18  ;;  %p1788_p7 = scmp.lt.s32.totalorder %s1782_s18, %s1782_s18 }
 0x227   :  { %p1789_p8 = por %p1788_p7, %p1787_p6 }
 0x229   :  { %p1790_p9 = pnand %p1789_p8, %p1783_p5 }
 0x2df   :  { %v1376_v29 = vpop.f32.mrf.mxu0 }
 0x2e0   :  { %v1377_v30 = vadd.f32 %v1417_v28, %v1376_v29 }
 0x2e1   :  { %v1749_v32 = vpop.f32.mrf.mxu0 }
 0x2e2   :  { %1381 = vst [vmem:[#allocation3] sm:$0x3] %v1377_v30 }
 0x2e3   :  { %1793 = shalt.err (!%p1790_p9)
}
 0x2e4   :  { %1391 = dma.vmem_to_hbm [thread:$0]  %s1389_s17, 32, %s2848_s7, [#allocation4]  }
 0x2e5   :  { %1802 = dma.done.wait [#allocation4], 32  }
 0x2e6   :  { %1803 = vsyncadd [#allocation4], 4294967264 }
 0x2e7   :  { %1804 = dma.done.wait [#allocation6], 32  }
 0x2e8   :  { %1805 = vsyncadd [#allocation6], 4294967264 }
 0x2e9   :  { %1408 = vsyncpa [#allocation4], 1 }
 0x2ea   :  { %1409 = vsyncpa [#allocation6], 1 }

</bundles_post_ra>
